<compile_context>
chip_gen: v7x
topology: tpu7x:2x2x1
jax: 0.10.0
libtpu: 0.0.40
codegen_flags: <defaults>
</compile_context>

<pallas_src>
import functools

import jax
import jax.numpy as jnp
from jax.experimental import pallas as pl
from jax.experimental.pallas import tpu as pltpu


def _cdiv(a, b):
    return -(-a // b)


def _physical_vmem_bytes():
    """Per-core physical VMEM; conservative (v7x-sized) fallback if unknown."""
    try:
        info = pltpu.get_tpu_info()
        v = getattr(info, "vmem_capacity_bytes", None)
        if v:
            return int(v)
    except Exception:
        pass
    return 64 * 1024 * 1024


def _choose_tile_hw(hw, n, per_pixel_bytes, vmem_budget, *,
                    max_tile_hw, min_total_steps):
    """Largest 128-multiple pixel tile that fits the VMEM budget, then shrunk
    until the (N, tiles) grid has enough steps for megacore + pipelining."""
    if hw < 128:
        return hw                               # full-extent block (legal, tiny case)
    by_budget = int(vmem_budget // max(per_pixel_bytes, 1))
    tile = min(max_tile_hw, by_budget, (hw // 128) * 128)
    tile = max(128, (tile // 128) * 128)
    # Guarantee >= min_total_steps grid steps so both v7x TensorCores get work
    # and the BlockSpec pipeline can overlap DMA with compute.
    while n * _cdiv(hw, tile) < min_total_steps and tile > 128:
        tile = max(128, ((tile // 2) // 128) * 128)
    return tile


def _vpu_channel_matmul(w, v):
    """(Co, C) @ (C, T) as C unrolled VPU broadcast-FMAs (f32 accumulation).

    For tiny C the MXU tile would be almost entirely zero padding; a handful of
    broadcast multiplies is free filler in this memory-bound kernel."""
    c_in = v.shape[0]
    acc = w[:, 0:1] * v[0:1, :]
    for k in range(1, c_in):
        acc = acc + w[:, k:k + 1] * v[k:k + 1, :]
    return acc


def _attention_gate_kernel(g_ref, x_ref, wg_ref, bg_ref, wx_ref, wa_ref, ba_ref,
                           o_ref, *, use_vpu_matmul):
    # g_ref: (Cg, T), x_ref: (Cx, T) -- pixels on the lane axis (lane-dense).
    # Native dtype is kept (no full-tile f32 upcast); accumulation is f32.
    g = g_ref[...]
    x = x_ref[...]

    if use_vpu_matmul:
        g_c = _vpu_channel_matmul(wg_ref[...], g)            # (Ci, T) f32
        x_c = _vpu_channel_matmul(wx_ref[...], x)            # (Ci, T) f32
    else:
        # 1x1 convs == channel matmuls: (Ci, C) @ (C, T) -> (Ci, T) on the MXU.
        g_c = jnp.dot(wg_ref[...], g, preferred_element_type=jnp.float32)
        x_c = jnp.dot(wx_ref[...], x, preferred_element_type=jnp.float32)

    combined = jnp.maximum(g_c + x_c + bg_ref[...], 0.0)     # ReLU, (Ci, T) f32

    # Attention logit: tiny Ci sublane reduction (XLU) -- no extra MXU round-trip.
    logit = jnp.sum(wa_ref[...] * combined, axis=0, keepdims=True) + ba_ref[0]
    alpha = jax.nn.sigmoid(logit)                             # (1, T) f32

    # Epilogue in x.dtype: cast the small (1, T) alpha, never the (Cx, T) x tile.
    o_ref[...] = (alpha.astype(x.dtype) * x).astype(o_ref.dtype)


def attention_gate_pallas(g, x, params, *, max_tile_hw=32768, min_total_steps=4,
                          vpu_channel_threshold=16, alias_x_to_out=False):
    """g, x: NCHW arrays with identical N, H, W.  Returns alpha * x (NCHW)."""
    assert max_tile_hw % 128 == 0
    N, Cg, H, W = g.shape
    Nx, Cx, Hx, Wx = x.shape
    assert (N, H, W) == (Nx, Hx, Wx), \
        "TODO(synk): F.interpolate branch (mismatched spatial sizes) not implemented"
    Ci = params["wg"].shape[0]
    HW = H * W

    # ---- VMEM-budget-derived pixel tile -------------------------------------
    bytes_g = jnp.dtype(g.dtype).itemsize
    bytes_x = jnp.dtype(x.dtype).itemsize
    # Per-pixel footprint: double-buffered streamed tiles (g, x, out) plus live
    # f32 intermediates (g_c, x_c/combined, alpha) inside the body.
    per_pixel = 2 * (Cg * bytes_g + 2 * Cx * bytes_x) + (3 * Ci + 2) * 4
    physical_vmem = _physical_vmem_bytes()
    budget = int(physical_vmem * 0.65)          # leave headroom for compiler scratch

    tile_hw = _choose_tile_hw(HW, N, per_pixel, budget,
                              max_tile_hw=max_tile_hw,
                              min_total_steps=min_total_steps)
    grid = (N, _cdiv(HW, tile_hw))

    weight_bytes = 2 * 4 * (Ci * Cg + Ci * Cx + 2 * Ci + 1)   # double-buffered, tiny
    tile_bytes = per_pixel * tile_hw + weight_bytes
    vmem_limit = int(min(physical_vmem - (4 << 20),
                         max(int(tile_bytes * 1.25), 32 << 20)))

    # NCHW -> (N, C, H*W): pure reshape of contiguous memory, no transpose pass.
    g3 = g.reshape(N, Cg, HW)
    x3 = x.reshape(N, Cx, HW)

    use_vpu = max(Ci, Cg, Cx) <= vpu_channel_threshold
    if use_vpu:
        wg_in = params["wg"].astype(jnp.float32)              # f32 VPU accumulation
        wx_in = params["wx"].astype(jnp.float32)
    else:
        wg_in = params["wg"].astype(g.dtype)                  # match MXU operand dtype
        wx_in = params["wx"].astype(x.dtype)
    bg = params["bg"].reshape(Ci, 1).astype(jnp.float32)
    wa = params["wa"].reshape(Ci, 1).astype(jnp.float32)
    ba = params["ba"].reshape(1).astype(jnp.float32)          # scalar -> SMEM

    extra_kwargs = {}
    if alias_x_to_out:
        # x (input 1) and out are tiled identically and each output tile fully
        # overwrites the tile just read; safe when the caller donates x.
        extra_kwargs["input_output_aliases"] = {1: 0}

    out3 = pl.pallas_call(
        functools.partial(_attention_gate_kernel, use_vpu_matmul=use_vpu),
        out_shape=jax.ShapeDtypeStruct((N, Cx, HW), x.dtype),
        grid=grid,
        in_specs=[
            pl.BlockSpec((None, Cg, tile_hw), lambda n, t: (n, 0, t)),
            pl.BlockSpec((None, Cx, tile_hw), lambda n, t: (n, 0, t)),
            pl.BlockSpec((Ci, Cg), lambda n, t: (0, 0)),
            pl.BlockSpec((Ci, 1), lambda n, t: (0, 0)),
            pl.BlockSpec((Ci, Cx), lambda n, t: (0, 0)),
            pl.BlockSpec((Ci, 1), lambda n, t: (0, 0)),
            pl.BlockSpec(memory_space=pltpu.MemorySpace.SMEM),
        ],
        out_specs=pl.BlockSpec((None, Cx, tile_hw), lambda n, t: (n, 0, t)),
        compiler_params=pltpu.CompilerParams(
            dimension_semantics=("parallel", "parallel"),
            vmem_limit_bytes=vmem_limit),
        **extra_kwargs,
    )(g3, x3, wg_in, bg, wx_in, wa, ba)

    return out3.reshape(N, Cx, H, W)


def init_params(key, nc_g, nc_x, nc_inner):
    """Deterministic kaiming-ish init mirroring the PyTorch module.

    Weights are stored in the PyTorch Conv2d (out, in) convention (1x1 kernels
    squeezed); biases are zeroed exactly like the module's __init__."""
    k1, k2, k3 = jax.random.split(key, 3)

    def kaiming(k, fan_in, shape):
        std = jnp.sqrt(2.0 / fan_in)
        return jax.random.normal(k, shape, dtype=jnp.float32) * std

    return {
        "wg": kaiming(k1, nc_g, (nc_inner, nc_g)),     # conv_g weight
        "bg": jnp.zeros((nc_inner,), jnp.float32),     # conv_g bias (zeroed)
        "wx": kaiming(k2, nc_x, (nc_inner, nc_x)),     # conv_x weight (no bias)
        "wa": kaiming(k3, nc_inner, (nc_inner,)),      # attention_map weight
        "ba": jnp.zeros((1,), jnp.float32),            # attention_map bias (zeroed)
    }


def attention_gate_ref(g, x, params):
    """Pure-JAX reference (same math, NCHW in/out, no Pallas)."""
    g_c = jnp.einsum("ik,nkhw->nihw", params["wg"], g) \
        + params["bg"][None, :, None, None]
    x_c = jnp.einsum("ik,nkhw->nihw", params["wx"], x)
    comb = jnp.maximum(g_c + x_c, 0.0)
    logit = jnp.einsum("i,nihw->nhw", params["wa"], comb)[:, None] + params["ba"][0]
    alpha = jax.nn.sigmoid(logit)
    return alpha * x


if __name__ == "__main__":
    key = jax.random.PRNGKey(0)
    kg, kx, kp, kg2, kx2, kp2 = jax.random.split(key, 6)

    # --- Case 1: tiny channels (VPU conv path), f32, HW=256 -> tiled grid ----
    nc_g, nc_x, nc_inner = 4, 4, 8
    N, H, W = 2, 16, 16
    g = jax.random.normal(kg, (N, nc_g, H, W), dtype=jnp.float32)
    x = jax.random.normal(kx, (N, nc_x, H, W), dtype=jnp.float32)
    params = init_params(kp, nc_g, nc_x, nc_inner)
    ref = attention_gate_ref(g, x, params)
    out = jax.block_until_ready(attention_gate_pallas(g, x, params))
    assert out.shape == x.shape and out.dtype == x.dtype
    assert jnp.allclose(out, ref, atol=1e-5, rtol=1e-5), "f32 VPU-path mismatch"

    # --- Case 2: 32 channels (MXU conv path), ragged H*W (20*20 = 400) ------
    nc2 = 32
    H2 = W2 = 20
    g2 = jax.random.normal(kg2, (N, nc2, H2, W2), dtype=jnp.float32)
    x2 = jax.random.normal(kx2, (N, nc2, H2, W2), dtype=jnp.float32)
    params2 = init_params(kp2, nc2, nc2, nc2)
    ref2 = attention_gate_ref(g2, x2, params2)
    out2 = jax.block_until_ready(attention_gate_pallas(g2, x2, params2))
    assert jnp.allclose(out2, ref2, atol=1e-4, rtol=1e-4), "f32 MXU ragged-tile mismatch"

    # --- Case 3: bf16 activations end-to-end (the big bandwidth win) --------
    g_bf = g.astype(jnp.bfloat16)
    x_bf = x.astype(jnp.bfloat16)
    out_bf = jax.block_until_ready(attention_gate_pallas(g_bf, x_bf, params))
    ref_bf = attention_gate_ref(g_bf.astype(jnp.float32),
                                x_bf.astype(jnp.float32), params)
    assert out_bf.dtype == jnp.bfloat16
    assert jnp.allclose(out_bf.astype(jnp.float32), ref_bf,
                        atol=5e-2, rtol=5e-2), "bf16 mismatch"

    print("KERNEL_OK")
</pallas_src>

<mosaic_0001>
module attributes {stable_mosaic.version = 11 : i64} {
  func.func @_attention_gate_kernel(%arg0: i32, %arg1: i32, %arg2: memref<1x4x128xf32, #tpu.memory_space<vmem>>, %arg3: memref<1x4x128xf32, #tpu.memory_space<vmem>>, %arg4: memref<8x4xf32, #tpu.memory_space<vmem>>, %arg5: memref<8x1xf32, #tpu.memory_space<vmem>>, %arg6: memref<8x4xf32, #tpu.memory_space<vmem>>, %arg7: memref<8x1xf32, #tpu.memory_space<vmem>>, %arg8: memref<1xf32, #tpu.memory_space<smem>>, %arg9: memref<1x4x128xf32, #tpu.memory_space<vmem>>) attributes {dimension_semantics = [#tpu.dimension_semantics<parallel>, #tpu.dimension_semantics<parallel>], iteration_bounds = array<i64: 2, 2>, scalar_prefetch = 0 : i64, scratch_operands = 0 : i64, tpu.core_type = #tpu.core_type<tc>, window_params = [{transform_indices = @transform_0, window_bounds = array<i64: 1, 4, 128>}, {transform_indices = @transform_1, window_bounds = array<i64: 1, 4, 128>}, {pipeline_mode = #tpu.pipeline_mode<synchronous>, transform_indices = @transform_2, window_bounds = array<i64: 8, 4>}, {pipeline_mode = #tpu.pipeline_mode<synchronous>, transform_indices = @transform_3, window_bounds = array<i64: 8, 1>}, {pipeline_mode = #tpu.pipeline_mode<synchronous>, transform_indices = @transform_4, window_bounds = array<i64: 8, 4>}, {pipeline_mode = #tpu.pipeline_mode<synchronous>, transform_indices = @transform_5, window_bounds = array<i64: 8, 1>}, {transform_indices = @transform_6, window_bounds = array<i64: 1>}, {transform_indices = @transform_7, window_bounds = array<i64: 1, 4, 128>}]} {
    %c0 = arith.constant 0 : index
    %c0_0 = arith.constant 0 : index
    %c0_1 = arith.constant 0 : index
    %0 = vector.load %arg2[%c0, %c0_0, %c0_1] : memref<1x4x128xf32, #tpu.memory_space<vmem>>, vector<1x4x128xf32>
    %1 = vector.shape_cast %0 : vector<1x4x128xf32> to vector<4x128xf32>
    %c0_2 = arith.constant 0 : index
    %c0_3 = arith.constant 0 : index
    %c0_4 = arith.constant 0 : index
    %2 = vector.load %arg3[%c0_2, %c0_3, %c0_4] : memref<1x4x128xf32, #tpu.memory_space<vmem>>, vector<1x4x128xf32>
    %3 = vector.shape_cast %2 : vector<1x4x128xf32> to vector<4x128xf32>
    %c0_5 = arith.constant 0 : index
    %c0_6 = arith.constant 0 : index
    %4 = vector.load %arg4[%c0_5, %c0_6] : memref<8x4xf32, #tpu.memory_space<vmem>>, vector<8x4xf32>
    %5 = vector.extract_strided_slice %4 {offsets = [0, 0], sizes = [8, 1], strides = [1, 1]} : vector<8x4xf32> to vector<8x1xf32>
    %6 = vector.extract_strided_slice %1 {offsets = [0, 0], sizes = [1, 128], strides = [1, 1]} : vector<4x128xf32> to vector<1x128xf32>
    %7 = vector.broadcast %5 : vector<8x1xf32> to vector<8x128xf32>
    %8 = vector.broadcast %6 : vector<1x128xf32> to vector<8x128xf32>
    %9 = arith.mulf %7, %8 : vector<8x128xf32>
    %10 = vector.extract_strided_slice %4 {offsets = [0, 1], sizes = [8, 1], strides = [1, 1]} : vector<8x4xf32> to vector<8x1xf32>
    %11 = vector.extract_strided_slice %1 {offsets = [1, 0], sizes = [1, 128], strides = [1, 1]} : vector<4x128xf32> to vector<1x128xf32>
    %12 = vector.broadcast %10 : vector<8x1xf32> to vector<8x128xf32>
    %13 = vector.broadcast %11 : vector<1x128xf32> to vector<8x128xf32>
    %14 = arith.mulf %12, %13 : vector<8x128xf32>
    %15 = arith.addf %9, %14 : vector<8x128xf32>
    %16 = vector.extract_strided_slice %4 {offsets = [0, 2], sizes = [8, 1], strides = [1, 1]} : vector<8x4xf32> to vector<8x1xf32>
    %17 = vector.extract_strided_slice %1 {offsets = [2, 0], sizes = [1, 128], strides = [1, 1]} : vector<4x128xf32> to vector<1x128xf32>
    %18 = vector.broadcast %16 : vector<8x1xf32> to vector<8x128xf32>
    %19 = vector.broadcast %17 : vector<1x128xf32> to vector<8x128xf32>
    %20 = arith.mulf %18, %19 : vector<8x128xf32>
    %21 = arith.addf %15, %20 : vector<8x128xf32>
    %22 = vector.extract_strided_slice %4 {offsets = [0, 3], sizes = [8, 1], strides = [1, 1]} : vector<8x4xf32> to vector<8x1xf32>
    %23 = vector.extract_strided_slice %1 {offsets = [3, 0], sizes = [1, 128], strides = [1, 1]} : vector<4x128xf32> to vector<1x128xf32>
    %24 = vector.broadcast %22 : vector<8x1xf32> to vector<8x128xf32>
    %25 = vector.broadcast %23 : vector<1x128xf32> to vector<8x128xf32>
    %26 = arith.mulf %24, %25 : vector<8x128xf32>
    %27 = arith.addf %21, %26 : vector<8x128xf32>
    %c0_7 = arith.constant 0 : index
    %c0_8 = arith.constant 0 : index
    %28 = vector.load %arg6[%c0_7, %c0_8] : memref<8x4xf32, #tpu.memory_space<vmem>>, vector<8x4xf32>
    %29 = vector.extract_strided_slice %28 {offsets = [0, 0], sizes = [8, 1], strides = [1, 1]} : vector<8x4xf32> to vector<8x1xf32>
    %30 = vector.extract_strided_slice %3 {offsets = [0, 0], sizes = [1, 128], strides = [1, 1]} : vector<4x128xf32> to vector<1x128xf32>
    %31 = vector.broadcast %29 : vector<8x1xf32> to vector<8x128xf32>
    %32 = vector.broadcast %30 : vector<1x128xf32> to vector<8x128xf32>
    %33 = arith.mulf %31, %32 : vector<8x128xf32>
    %34 = vector.extract_strided_slice %28 {offsets = [0, 1], sizes = [8, 1], strides = [1, 1]} : vector<8x4xf32> to vector<8x1xf32>
    %35 = vector.extract_strided_slice %3 {offsets = [1, 0], sizes = [1, 128], strides = [1, 1]} : vector<4x128xf32> to vector<1x128xf32>
    %36 = vector.broadcast %34 : vector<8x1xf32> to vector<8x128xf32>
    %37 = vector.broadcast %35 : vector<1x128xf32> to vector<8x128xf32>
    %38 = arith.mulf %36, %37 : vector<8x128xf32>
    %39 = arith.addf %33, %38 : vector<8x128xf32>
    %40 = vector.extract_strided_slice %28 {offsets = [0, 2], sizes = [8, 1], strides = [1, 1]} : vector<8x4xf32> to vector<8x1xf32>
    %41 = vector.extract_strided_slice %3 {offsets = [2, 0], sizes = [1, 128], strides = [1, 1]} : vector<4x128xf32> to vector<1x128xf32>
    %42 = vector.broadcast %40 : vector<8x1xf32> to vector<8x128xf32>
    %43 = vector.broadcast %41 : vector<1x128xf32> to vector<8x128xf32>
    %44 = arith.mulf %42, %43 : vector<8x128xf32>
    %45 = arith.addf %39, %44 : vector<8x128xf32>
    %46 = vector.extract_strided_slice %28 {offsets = [0, 3], sizes = [8, 1], strides = [1, 1]} : vector<8x4xf32> to vector<8x1xf32>
    %47 = vector.extract_strided_slice %3 {offsets = [3, 0], sizes = [1, 128], strides = [1, 1]} : vector<4x128xf32> to vector<1x128xf32>
    %48 = vector.broadcast %46 : vector<8x1xf32> to vector<8x128xf32>
    %49 = vector.broadcast %47 : vector<1x128xf32> to vector<8x128xf32>
    %50 = arith.mulf %48, %49 : vector<8x128xf32>
    %51 = arith.addf %45, %50 : vector<8x128xf32>
    %52 = arith.addf %27, %51 : vector<8x128xf32>
    %c0_9 = arith.constant 0 : index
    %c0_10 = arith.constant 0 : index
    %53 = vector.load %arg5[%c0_9, %c0_10] : memref<8x1xf32, #tpu.memory_space<vmem>>, vector<8x1xf32>
    %54 = vector.broadcast %53 : vector<8x1xf32> to vector<8x128xf32>
    %55 = arith.addf %52, %54 : vector<8x128xf32>
    %cst = arith.constant 0.000000e+00 : f32
    %56 = vector.broadcast %cst : f32 to vector<8x128xf32>
    %57 = arith.maximumf %55, %56 : vector<8x128xf32>
    %c0_11 = arith.constant 0 : index
    %c0_12 = arith.constant 0 : index
    %58 = vector.load %arg7[%c0_11, %c0_12] : memref<8x1xf32, #tpu.memory_space<vmem>>, vector<8x1xf32>
    %59 = vector.broadcast %58 : vector<8x1xf32> to vector<8x128xf32>
    %60 = arith.mulf %59, %57 : vector<8x128xf32>
    %cst_13 = arith.constant dense<0.000000e+00> : vector<128xf32>
    %61 = vector.multi_reduction <add>, %60, %cst_13 [0] : vector<8x128xf32> to vector<128xf32>
    %62 = vector.shape_cast %61 : vector<128xf32> to vector<1x128xf32>
    %c0_14 = arith.constant 0 : index
    %63 = memref.load %arg8[%c0_14] : memref<1xf32, #tpu.memory_space<smem>>
    %64 = vector.broadcast %63 : f32 to vector<1x128xf32>
    %65 = arith.addf %62, %64 : vector<1x128xf32>
    %66 = arith.negf %65 : vector<1x128xf32>
    %67 = math.exp %66 : vector<1x128xf32>
    %cst_15 = arith.constant 1.000000e+00 : f32
    %68 = vector.broadcast %cst_15 : f32 to vector<1x128xf32>
    %69 = arith.addf %68, %67 : vector<1x128xf32>
    %70 = arith.divf %68, %69 : vector<1x128xf32>
    %71 = vector.broadcast %70 : vector<1x128xf32> to vector<4x128xf32>
    %72 = arith.mulf %71, %3 : vector<4x128xf32>
    %c0_16 = arith.constant 0 : index
    %c0_17 = arith.constant 0 : index
    %c0_18 = arith.constant 0 : index
    %73 = vector.load %arg9[%c0_16, %c0_17, %c0_18] : memref<1x4x128xf32, #tpu.memory_space<vmem>>, vector<1x4x128xf32>
    %74 = vector.shape_cast %73 : vector<1x4x128xf32> to vector<4x128xf32>
    %75 = vector.shape_cast %72 : vector<4x128xf32> to vector<1x4x128xf32>
    tpu.vector_store %arg9[%c0_16, %c0_17, %c0_18], %75 {strides = array<i32>} : memref<1x4x128xf32, #tpu.memory_space<vmem>>, vector<1x4x128xf32>,
    return
  }
  func.func @transform_0(%arg0: i32, %arg1: i32) -> (i32, i32, i32) {
    %c0_i32 = arith.constant 0 : i32
    %c0_i32_0 = arith.constant 0 : i32
    return %arg0, %c0_i32, %arg1 : i32, i32, i32
  }
  func.func @transform_1(%arg0: i32, %arg1: i32) -> (i32, i32, i32) {
    %c0_i32 = arith.constant 0 : i32
    %c0_i32_0 = arith.constant 0 : i32
    return %arg0, %c0_i32, %arg1 : i32, i32, i32
  }
  func.func @transform_2(%arg0: i32, %arg1: i32) -> (i32, i32) {
    %c0_i32 = arith.constant 0 : i32
    %c0_i32_0 = arith.constant 0 : i32
    %c0_i32_1 = arith.constant 0 : i32
    return %c0_i32, %c0_i32_0 : i32, i32
  }
  func.func @transform_3(%arg0: i32, %arg1: i32) -> (i32, i32) {
    %c0_i32 = arith.constant 0 : i32
    %c0_i32_0 = arith.constant 0 : i32
    %c0_i32_1 = arith.constant 0 : i32
    return %c0_i32, %c0_i32_0 : i32, i32
  }
  func.func @transform_4(%arg0: i32, %arg1: i32) -> (i32, i32) {
    %c0_i32 = arith.constant 0 : i32
    %c0_i32_0 = arith.constant 0 : i32
    %c0_i32_1 = arith.constant 0 : i32
    return %c0_i32, %c0_i32_0 : i32, i32
  }
  func.func @transform_5(%arg0: i32, %arg1: i32) -> (i32, i32) {
    %c0_i32 = arith.constant 0 : i32
    %c0_i32_0 = arith.constant 0 : i32
    %c0_i32_1 = arith.constant 0 : i32
    return %c0_i32, %c0_i32_0 : i32, i32
  }
  func.func @transform_6(%arg0: i32, %arg1: i32) -> i32 {
    %c0_i32 = arith.constant 0 : i32
    %c0_i32_0 = arith.constant 0 : i32
    return %c0_i32 : i32
  }
  func.func @transform_7(%arg0: i32, %arg1: i32) -> (i32, i32, i32) {
    %c0_i32 = arith.constant 0 : i32
    %c0_i32_0 = arith.constant 0 : i32
    return %arg0, %c0_i32, %arg1 : i32, i32, i32
  }
}

</mosaic_0001>

<bundles_post_ra>
// kernel: tpu_custom_call.1
= control target key start
LH: loop header
LB: loop body
LE: loop exit
PB: predicated region body
PF: predicated region fallthrough
CT: control target
= control target key end

     0   :  { %s963_s0 = inlined_call_operand.vmem [shape: f32[2,4,256], index: 0, kind: input, shape index: {}]   ;;  %s964_s1 = inlined_call_operand.vmem [shape: f32[2,4,256], index: 1, kind: input, shape index: {}]   ;;  %s965_s2 = inlined_call_operand.vmem [shape: f32[8,4], index: 2, kind: input, shape index: {}]   ;;  %s966_s3 = inlined_call_operand.vmem [shape: f32[8,1], index: 3, kind: input, shape index: {}]   ;;  %s967_s4 = inlined_call_operand.vmem [shape: f32[8,4], index: 4, kind: input, shape index: {}]   ;;  %s968_s5 = inlined_call_operand.vmem [shape: f32[8,1], index: 5, kind: input, shape index: {}]   ;;  %s969_s6 = inlined_call_operand.<no memory space> [shape: f32[1], index: 6, kind: input, shape index: {}]   ;;  %s970_s7 = inlined_call_operand.hbm [shape: f32[2,4,256], index: 7, kind: output, shape index: {}]  }
   0x1   :  { %971 = sst [smem:[#allocation6_spill]] %s963_s0 }
   0x2   :  { %12 = sst [smem:[#allocation2]] %s969_s6 }
   0x3   :  { %13 = vsyncpa [#allocation4], 0 }
   0x4   :  { %15 = vsyncpa [#allocation4 + $0x1], 0  ;;  %s811_s26 = smov 0   ;;  %s813_s27 = smov 0  }
   0x5   :  { %s815_s28 = smov 0   ;;  %s817_s29 = smov 0  }
   0x6   :  { %s819_s30 = smov 0   ;;  %s821_s8 = smov 0  }
   0x7   :  { %s823_s9 = smov 0   ;;  %s825_s10 = smov 0  }
   0x8 LB: > { %s563_s6 = sadd.s32 4294967295, %s761_s10   ;;  %s564_s11 = sadd.s32 4294967294, %s761_s10   ;;  %s761_s10 = sphi %s825_s10, %s21_s10   ;;  %s757_s9 = sphi %s823_s9, %s981_s9   ;;  %s753_s8 = sphi %s821_s8, %s980_s8   ;;  %s749_s30 = sphi %s819_s30, %s979_s30   ;;  %s745_s29 = sphi %s817_s29, %s978_s29   ;;  %s741_s28 = sphi %s815_s28, %s977_s28   ;;  %s737_s27 = sphi %s813_s27, %s976_s27   ;;  %s733_s26 = sphi %s811_s26, %s975_s26  }
   0x9   : > { %s30_s12 = sadd.s32 1, %s753_s8  ;;  %s33_s13 = sadd.s32 1, %s757_s9 }
   0xa   : > { %p31_p0 = scmp.ge.s32.totalorder %s30_s12, 2  ;;  %p213_p1 = scmp.ne.s32.totalorder %s741_s28, %s737_s27 }
   0xb   : > { %p214_p2 = scmp.eq.s32.totalorder %s563_s6, 3  ;;  %p219_p5 = scmp.ne.s32.totalorder %s737_s27, %s733_s26 }
   0xc   : > { %s983_s12 = smov (%p31_p0, %s30_s12), 0  ;;  %s985_s13 = smov (!%p31_p0, %s33_s13), %s757_s9 }
   0xd   : > { %s199_s14 = ssub.s32 %s753_s8, %s983_s12  ;;  %p862_p3 = por %p214_p2, %p213_p1 }
   0xe   : > { %p35_p4 = scmp.ge.s32.totalorder %s985_s13, 2  ;;  %p220_p6 = scmp.eq.s32.totalorder %s564_s11, 3 }
   0xf   : > { %p567_p7 = scmp.ge.s32.totalorder %s761_s10, 1  ;;  %p275_p9 = scmp.lt.s32.totalorder %s761_s10, 5 }
  0x10   : > { %s987_s13 = smov (%p35_p4, %s985_s13), 0  ;;  %p871_p8 = por %p220_p6, %p219_p5 }
  0x11   : > { %s198_s17 = ssub.s32 %s757_s9, %s987_s13  ;;  %s203_s18 = sadd.s32 1, %s741_s28 }
  0x12   : > { %s200_s19 = sor.u32 %s199_s14, %s198_s17  ;;  %p276_p10 = pnand %p567_p7, %p275_p9 }
  0x13   : > { %p201_p11 = scmp.eq.s32.totalorder %s200_s19, 0  ;;  %v377_v0 = vld [vmem:[%s967_s4] sm:$0xff] (!%p276_p10)  ;;  %v763_v2 = vmov (!%p276_p10), 0   ;;  %v764_v3 = vmov (!%p276_p10), 1   ;;  %v765_v4 = vmov (!%p276_p10), 2   ;;  %v766_v6 = vmov (!%p276_p10), 3  }
  0x14   : > { %279 = sbr.rel (%p276_p10) target bundleno = 237 (0xed), region = 48  ;;  %v336_v1 = vld [vmem:[%s965_s2] sm:$0xff] (!%p276_p10)  ;;  %656 = vset.pattern.permute.xlu1 (!%p276_p10), %v763_v2  ;;  %654 = vset.pattern.permute.xlu0 (!%p276_p10), %v763_v2  ;;  %p318_p12 = scmp.lt.s32.totalorder (!%p276_p10), %s749_s30, 1  ;;  %v342_v8 = vlaneseq (!%p276_p10) }
  0x15   : > { %s880_s20 = scalar_select %p201_p11, %s741_s28, %s203_s18  }
  0x16   : > { %380 = vperm.xlu1 (!%p276_p10), %656, %v377_v0   ;;  %339 = vperm.xlu0 (!%p276_p10), %654, %v336_v1   ;;  %v419_v5 = vld [vmem:[%s966_s3] sm:$0xff] (!%p276_p10)  ;;  %p320_p13 = scmp.lt.s32.totalorder (!%p276_p10), %s745_s29, 1  ;;  %v343_v11 = vshrl.u32 (!%p276_p10), %v342_v8, 7  ;;  %s974_s0 = sld [smem:[#allocation6_spill]] (!%p276_p10) }
  0x17   : > { %v427_v7 = vld [vmem:[%s968_s5] sm:$0xff] (!%p276_p10) }
  0x18   : > { %v344_v14 = vsub.s32 (!%p276_p10), 0, %v343_v11  ;;  %v353_v15 = vsub.s32 (!%p276_p10), 1, %v343_v11  ;;  %v363_v20 = vsub.s32 (!%p276_p10), 2, %v343_v11  ;;  %v373_v23 = vsub.s32 (!%p276_p10), 3, %v343_v11 }
  0x1a   : > { %657 = vset.pattern.permute.xlu1 (!%p276_p10), %v764_v3  ;;  %655 = vset.pattern.permute.xlu0 (!%p276_p10), %v764_v3 }
  0x1b   : > { %389 = vperm.xlu1 %657, %v377_v0   ;;  %348 = vperm.xlu0 %655, %v336_v1   ;;  %s319_s17 = scalar_select %p318_p12, %s749_s30, 1 }
  0x1c   : > { %s321_s18 = scalar_select %p320_p13, %s745_s29, 1 }
  0x1d   : > { %s569_s19 = sshll.u32 %s319_s17, 1  ;;  %s440_s17 = sld [smem:[#allocation2]] }
  0x1e   : > { %s323_s21 = sadd.s32 %s569_s19, %s321_s18  ;;  %s315_s18 = sand.u32 1, %s737_s27  }
  0x1f   : > { %658 = vset.pattern.permute.xlu1 %v765_v4  ;;  %659 = vset.pattern.permute.xlu0 %v765_v4  ;;  %s570_s22 = sshll.u32 %s323_s21, 2  ;;  %s568_s19 = sshll.u32 %s315_s18, 2 }
  0x20   : > { %358 = vperm.xlu1 %658, %v336_v1   ;;  %399 = vperm.xlu0 %659, %v377_v0   ;;  %s325_s25 = scalar_lea.vmem %s974_s0, %s570_s22  ;;  %s333_s14 = scalar_lea.vmem %s964_s1, %s570_s22 }
  0x21   : > { %v334_v12 = vld [vmem:[%s325_s25] sm:$0xf]  ;;  %s575_s21 = sshll.u32 %s749_s30, 1  ;;  %s317_s24 = scalar_lea.vmem [#allocation3], %s568_s19 }
  0x22   : > { %v335_v17 = vld [vmem:[%s333_s14] sm:$0xf]  ;;  %v345_v18 = vrot.slane %v334_v12, %v344_v14  ;;  %v354_v19 = vrot.slane %v334_v12, %v353_v15  ;;  %v364_v27 = vrot.slane %v334_v12, %v363_v20  ;;  %v374_v31 = vrot.slane %v334_v12, %v373_v23  ;;  %s463_s22 = sadd.s32 %s745_s29, %s575_s21  ;;  %s467_s25 = sshll.u32 %s317_s24, 4  ;;  %s912_s25 = int_to_ptr.vmem [resolvable:$true] %s467_s25 }
  0x23   : > { %v395_v21 = vrot.slane %v335_v17, %v353_v15  ;;  %v386_v24 = vrot.slane %v335_v17, %v344_v14  ;;  %v405_v28 = vrot.slane %v335_v17, %v363_v20  ;;  %v415_v33 = vrot.slane %v335_v17, %v373_v23  ;;  %s576_s23 = sshll.u32 %s463_s22, 6  ;;  %s667_s0 = scalar_lea.vmem %s912_s25, 64 }
  0x24   : > { %660 = vset.pattern.permute.xlu1 %v766_v6  ;;  %661 = vset.pattern.permute.xlu0 %v763_v2  ;;  %v441_v57 = vstv %s440_s17  ;;  %s910_s14 = scalar_lea.hbm %s970_s7, %s576_s23  ;;  %s452_s17 = scalar_lea.sflag [#allocation4], %s315_s18 }
  0x25   : > { %368 = vperm.xlu1 %660, %v336_v1   ;;  %422 = vperm.xlu0 %661, %v419_v5   ;;  %p668_p0 = scmp.ne.s32.totalorder %s912_s25, %s667_s0  ;;  %s767_s29 = smov [#allocation3]  }
  0x26   : > { %s671_s30 = sshll.u32 %s767_s29, 4  ;;  %s672_s30 = int_to_ptr.vmem [resolvable:$false] %s671_s30 }
  0x27   : > { %p669_p1 = pnand %p668_p0, %p862_p3  ;;  %s673_s19 = scalar_lea.vmem %s672_s30, 128 }
  0x28   : > { %p674_p4 = scmp.lt.s32.totalorder %s912_s25, %s672_s30  ;;  %p675_p5 = scmp.lt.s32.totalorder %s673_s19, %s667_s0 }
  0x29   : > { %409 = vperm.xlu1 %660, %v377_v0   ;;  %p670_p2 = pneg %p669_p1 }
  0x2a   : > { %p676_p6 = por %p675_p5, %p674_p4 }
  0x2c   : > { %p677_p7 = pnand %p676_p6, %p670_p2 }
  0x2d   : > { %662 = vset.pattern.permute.xlu1 %v763_v2 }
  0x2e   : > { %430 = vperm.xlu1 %662, %v427_v7  }
  0x95   : > { %v381_v9 = vpop.permute.xlu1 %380  ;;  %v340_v10 = vpop.permute.xlu0 %339 }
  0x96   : > { %v346_v25 = vmul.f32 %v345_v18, %v340_v10  ;;  %v387_v34 = vmul.f32 %v386_v24, %v381_v9 }
  0x9a   : > { %v390_v13 = vpop.permute.xlu1 %389  ;;  %v349_v16 = vpop.permute.xlu0 %348 }
  0x9b   : > { %v355_v26 = vmul.f32 %v354_v19, %v349_v16  ;;  %v396_v30 = vmul.f32 %v395_v21, %v390_v13 }
  0x9d   : > { %v356_v35 = vadd.f32 %v355_v26, %v346_v25  ;;  %v397_v38 = vadd.f32 %v396_v30, %v387_v34 }
  0x9f   : > { %v359_v22 = vpop.permute.xlu1 %358  ;;  %v400_v29 = vpop.permute.xlu0 %399 }
  0xa0   : > { %v365_v36 = vmul.f32 %v364_v27, %v359_v22  ;;  %v406_v37 = vmul.f32 %v405_v28, %v400_v29 }
  0xa2   : > { %v366_v41 = vadd.f32 %v365_v36, %v356_v35  ;;  %v407_v42 = vadd.f32 %v406_v37, %v397_v38 }
  0xa4   : > { %v369_v32 = vpop.permute.xlu1 %368  ;;  %v423_v46 = vpop.permute.xlu0 %422 }
  0xa5   : > { %v375_v39 = vmul.f32 %v374_v31, %v369_v32 }
  0xa7   : > { %v376_v44 = vadd.f32 %v375_v39, %v366_v41 }
  0xa8   : > { %v410_v40 = vpop.permute.xlu1 %409 }
  0xa9   : > { %v416_v43 = vmul.f32 %v415_v33, %v410_v40 }
  0xab   : > { %v417_v45 = vadd.f32 %v416_v43, %v407_v42 }
  0xad   : > { %v418_v47 = vadd.f32 %v417_v45, %v376_v44  ;;  %v431_v49 = vpop.permute.xlu1 %430 }
  0xaf   : > { %v425_v48 = vadd.f32 %v423_v46, %v418_v47 }
  0xb1   : > { %v426_v50 = vmax.f32 %v425_v48, 0.0 }
  0xb3   : > { %v433_v51 = vmul.f32 %v431_v49, %v426_v50 }
  0xb5   : > { %v434_v52 = vrot.slane %v433_v51, 4 }
  0xb7   : > { %v435_v53 = vadd.f32 %v434_v52, %v433_v51 }
  0xb9   : > { %v436_v54 = vrot.slane %v435_v53, 2 }
  0xbb   : > { %v437_v55 = vadd.f32 %v436_v54, %v435_v53 }
  0xbd   : > { %v438_v56 = vrot.slane %v437_v55, 1 }
  0xbf   : > { %v439_v58 = vadd.f32 %v438_v56, %v437_v55 }
  0xc1   : > { %v442_v59 = vadd.f32 %v441_v57, %v439_v58 }
  0xc3   : > { %v573_v60 = vmul.f32 -1.442695, %v442_v59 }
  0xc5   : > { %663 = vpow2.f32 %v573_v60 }
  0xcf   : > { %v664_v61 = vpop.eup %663 }
  0xd0   : > { %v446_v62 = vadd.f32 1.0, %v664_v61 }
  0xd2   : > { %665 = vrcp.f32 %v446_v62 }
  0xdc   : > { %v666_v63 = vpop.eup %665 }
  0xdd   : > { %v449_v0 = vmul.f32 %v666_v63, %v335_v17 }
  0xdf   : > { %450 = vst [vmem:[%s317_s24] sm:$0xf] %v449_v0 }
  0xe0   : > { %680 = shalt.err (!%p677_p7)
}
  0xe1   : > { %s681_s18 = scalar_lea.hbm %s910_s14, 64  ;;  %s685_s23 = scalar_lea.hbm %s970_s7, 256 }
  0xe2   : > { %p682_p9 = scmp.ne.s32.totalorder %s910_s14, %s681_s18  ;;  %p686_p12 = scmp.lt.u32.totalorder %s910_s14, %s970_s7 }
  0xe3   : > { %p687_p13 = scmp.lt.u32.totalorder %s685_s23, %s681_s18  ;;  %p689_p1 = scmp.lt.u32.totalorder %s681_s18, %s910_s14 }
  0xe4   : > { %p683_p10 = pnand %p682_p9, %p862_p3 }
  0xe5   : > { %p688_p0 = por %p687_p13, %p686_p12 }
  0xe6   : > { %p684_p11 = pneg %p683_p10 }
  0xe7   : > { %p690_p2 = por %p689_p1, %p688_p0 }
  0xe9   : > { %p691_p4 = pnand %p690_p2, %p684_p11 }
  0xeb   : > { %694 = shalt.err (!%p691_p4)
}
  0xec   : > { %579 = dma.vmem_to_hbm [thread:$0]  (%p862_p3), %s912_s25, 64, %s910_s14, %s452_s17  }
  0xed PF: > { %p585_p5 = scmp.ge.s32.totalorder %s761_s10, 2  ;;  %s479_s0 = sand.u32 1, %s733_s26  }
  0xee   : > { %s480_s11 = scalar_lea.sflag [#allocation4], %s479_s0 }
  0xef   : > { %p582_p6 = pnand %p585_p5, %p871_p8 }
  0xf1   : > { %728 = dma.done.wait (!%p582_p6), %s480_s11, 64  }
  0xf2   : > { %730 = vsyncadd (!%p582_p6), %s480_s11, 4294967232  ;;  %s21_s10 = sadd.s32 1, %s761_s10   ;;  %s975_s26 = smov %s737_s27 }
  0xf3   : > { %p18_p7 = scmp.ge.s32.totalorder %s21_s10, 6   ;;  %s976_s27 = smov %s741_s28 }
  0xf4   : > { %s977_s28 = smov %s880_s20  ;;  %s978_s29 = smov %s753_s8 }
  0xf5   : > { %s979_s30 = smov %s757_s9  ;;  %s980_s8 = smov %s983_s12 }
  0xf6   : > { %s981_s9 = smov %s987_s13  ;;  %20 = sbr.rel (!%p18_p7) target bundleno = 8 (0x8), region = 86 }
  0xfd   :  { %485 = vsyncpa [#allocation4], 1 }
  0xfe   :  { %487 = vsyncpa [#allocation4 + $0x1], 1 }

</bundles_post_ra>
